<compile_context>
chip_gen: v7x
topology: tpu7x:2x2x1
jax: 0.10.0
libtpu: 0.0.40
codegen_flags: <defaults>
</compile_context>

<pallas_src>
import functools

import jax
import jax.numpy as jnp
import numpy as np
from jax.experimental import pallas as pl
from jax.experimental.pallas import tpu as pltpu


def _round_up(x, m):
    return ((x + m - 1) // m) * m


# ---------------------------------------------------------------------------
# Kernel 1: batched, non-recurrent  gi = relu(x @ W1 + b1) @ W_ih + b_ih
# ---------------------------------------------------------------------------
def _precompute_kernel(x_ref, w1_ref, b1_ref, wih_ref, bih_ref, gi_ref):
    z1 = jnp.dot(x_ref[...], w1_ref[...],
                 preferred_element_type=jnp.float32) + b1_ref[...]
    xr = jnp.maximum(z1, 0.0)                                # (R, H) f32
    gi = jnp.dot(xr.astype(wih_ref.dtype), wih_ref[...],
                 preferred_element_type=jnp.float32) + bih_ref[...]
    gi_ref[...] = gi.astype(gi_ref.dtype)


# ---------------------------------------------------------------------------
# Kernel 2: whole rollout chunk in ONE invocation.
#   - in-kernel fori_loop over timesteps (GRU cell only on the serial path),
#   - gi / weights / hidden carry fully VMEM-resident,
#   - fc2 done once, batched over every row of the chunk, after the loop.
# ---------------------------------------------------------------------------
def _gru_chunk_kernel(gi_ref, h0_ref, whh_ref, bhh_ref, w2_ref, b2_ref,
                      hh_ref, q_ref, hlast_ref, h_scr,
                      *, n_steps, step_rows, unroll):
    H = h0_ref.shape[-1]
    h_scr[...] = h0_ref[...]                                 # init exactly once

    def step(t, carry):
        off = pl.multiple_of(t * step_rows, step_rows)
        gi = gi_ref[pl.ds(off, step_rows), :].astype(jnp.float32)   # (N, 3H)
        h = h_scr[...]                                               # (N, H) f32
        gh = jnp.dot(h.astype(whh_ref.dtype), whh_ref[...],
                     preferred_element_type=jnp.float32) + bhh_ref[...]

        i_r, i_z, i_n = gi[:, 0:H], gi[:, H:2 * H], gi[:, 2 * H:3 * H]
        h_r, h_z, h_n = gh[:, 0:H], gh[:, H:2 * H], gh[:, 2 * H:3 * H]

        r = jax.nn.sigmoid(i_r + h_r)
        z = jax.nn.sigmoid(i_z + h_z)
        n = jnp.tanh(i_n + r * h_n)
        hh = (1.0 - z) * n + z * h                                   # (N, H) f32

        h_scr[...] = hh
        hh_ref[pl.ds(off, step_rows), :] = hh
        return carry

    jax.lax.fori_loop(0, n_steps, step, 0, unroll=unroll)

    hlast_ref[...] = h_scr[...]

    # Batched fc2 over all rows of the chunk: wide-M MXU pass, off the serial
    # path. q is lane-padded to 128 so the store is a full unmasked vst.
    hh_all = hh_ref[...]
    q_ref[...] = jnp.dot(hh_all.astype(w2_ref.dtype), w2_ref[...],
                         preferred_element_type=jnp.float32) + b2_ref[...]


# ---------------------------------------------------------------------------
# Parameter preparation (hoisted: pay casts / padding once per param set)
# ---------------------------------------------------------------------------
def prepare_params(params, matmul_dtype=jnp.float32):
    """Cast MXU operands (f32 or bf16) and lane-pad fc2 to 128 output lanes.
    Biases stay f32 (added to f32 accumulators). bf16 is valid on v5e too."""
    wd = matmul_dtype
    H = params["w1"].shape[1]
    O = params["w2"].shape[1]
    O_pad = _round_up(O, 128)
    w2_pad = jnp.zeros((H, O_pad), wd).at[:, :O].set(params["w2"].astype(wd))
    b2_pad = jnp.zeros((1, O_pad), jnp.float32).at[:, :O].set(
        params["b2"].astype(jnp.float32))
    return {
        "w1":    params["w1"].astype(wd),
        "b1":    params["b1"].astype(jnp.float32),
        "w_ih":  params["w_ih"].astype(wd),
        "b_ih":  params["b_ih"].astype(jnp.float32),
        "w_hh":  params["w_hh"].astype(wd),
        "b_hh":  params["b_hh"].astype(jnp.float32),
        "w2_pad": w2_pad,
        "b2_pad": b2_pad,
        "b2":    params["b2"].astype(jnp.float32),   # unpadded, for out_dim
    }


def _pick_row_tile(rows, e, H, x_bytes, gi_bytes, w_bytes):
    """Largest row tile whose double-buffered in/out blocks + resident weights
    fit a ~16 MiB working-set target; capped so the grid has >=2 blocks when
    possible (v7x has 2 TensorCores)."""
    budget = 16 * 1024 * 1024
    weights = (e * H + 3 * H * H) * w_bytes + 4 * H * 4
    per_row = 2 * (e * x_bytes + 3 * H * gi_bytes)
    tile = (budget - 2 * weights) // max(per_row, 1)
    tile = max(8, min(2048, (tile // 8) * 8))
    if rows >= 16:
        tile = min(tile, _round_up((rows + 1) // 2, 8))
    return max(8, min(tile, _round_up(rows, 8)))


# ---------------------------------------------------------------------------
# Wrappers
# ---------------------------------------------------------------------------
def nrnn_agent_forward_seq(inputs_seq, hidden_state, params, *,
                           matmul_dtype=jnp.float32):
    """T-step rollout. inputs_seq: (T, b, a, e); hidden_state: (b, a, H).
    Returns (q_seq (T, b, a, O), hh_seq (T, b, a, H)); each step matches
    NRNNAgent.forward semantics exactly. `params` may be raw or prepared."""
    if "w2_pad" not in params:
        params = prepare_params(params, matmul_dtype)

    wd = params["w1"].dtype
    gi_dtype = wd                    # bf16 gi halves the inter-kernel round trip
    x_bytes = jnp.dtype(wd).itemsize
    gi_bytes = jnp.dtype(gi_dtype).itemsize
    w_bytes = x_bytes

    T, b, a, e = inputs_seq.shape
    H = params["w1"].shape[1]
    O = params["b2"].shape[1]
    O_pad = params["w2_pad"].shape[1]
    N = b * a
    N_pad = _round_up(N, 8)
    rows = T * N_pad

    # Flatten rows, cast once in the wrapper, pad N to a sublane multiple.
    x = inputs_seq.reshape(T, N, e).astype(wd)
    h0 = hidden_state.reshape(N, H).astype(jnp.float32)
    if N_pad != N:
        x = jnp.pad(x, ((0, 0), (0, N_pad - N), (0, 0)))
        h0 = jnp.pad(h0, ((0, N_pad - N), (0, 0)))
    x2d = x.reshape(rows, e)

    # --- kernel 1: gi for all (t, row) at once, row-tiled "parallel" grid ----
    ROW_TILE = _pick_row_tile(rows, e, H, x_bytes, gi_bytes, w_bytes)
    R_pad = _round_up(rows, ROW_TILE)
    if R_pad != rows:
        x2d = jnp.pad(x2d, ((0, R_pad - rows), (0, 0)))

    full1 = lambda r: (0, 0)
    gi_cost = pl.CostEstimate(
        flops=2 * R_pad * (e * H + H * 3 * H),
        transcendentals=0,
        bytes_accessed=(R_pad * e * x_bytes + R_pad * 3 * H * gi_bytes
                        + (e * H + 3 * H * H) * w_bytes + 4 * H * 4),
    )
    gi = pl.pallas_call(
        _precompute_kernel,
        out_shape=jax.ShapeDtypeStruct((R_pad, 3 * H), gi_dtype),
        grid_spec=pltpu.PrefetchScalarGridSpec(
            num_scalar_prefetch=0,
            grid=(R_pad // ROW_TILE,),
            in_specs=[
                pl.BlockSpec((ROW_TILE, e), lambda r: (r, 0)),
                pl.BlockSpec((e, H), full1),
                pl.BlockSpec((1, H), full1),
                pl.BlockSpec((H, 3 * H), full1),
                pl.BlockSpec((1, 3 * H), full1),
            ],
            out_specs=pl.BlockSpec((ROW_TILE, 3 * H), lambda r: (r, 0)),
        ),
        compiler_params=pltpu.CompilerParams(
            dimension_semantics=("parallel",),
            vmem_limit_bytes=32 * 1024 * 1024),
        cost_estimate=gi_cost,
    )(x2d, params["w1"], params["b1"], params["w_ih"], params["b_ih"])
    # NOTE: no gi[:rows] slice -- kernel 2 only reads the first `rows` rows,
    # so the ROW_TILE tail padding is never consumed.

    # --- kernel 2: chunked, fully VMEM-resident rollout ----------------------
    # Budget: keep gi + hh + q + weights under ~75% of the 32 MiB scoped VMEM
    # default (safe on v5e/v6e/v7x); chunk the time axis otherwise.
    fixed_bytes = ((H * 3 * H + H * O_pad) * w_bytes + (3 * H + O_pad) * 4
                   + 4 * N_pad * H * 4)
    per_step_bytes = N_pad * (3 * H * gi_bytes + (H + O_pad) * 4)
    budget = int(0.75 * (32 << 20))
    T_chunk = max(1, min(T, (budget - fixed_bytes) // max(per_step_bytes, 1)))

    full2 = lambda i: (0, 0)
    hh_chunks, q_chunks = [], []
    h_carry = h0
    t0 = 0
    while t0 < T:
        n_steps = min(T_chunk, T - t0)
        chunk_rows = n_steps * N_pad
        if t0 == 0 and n_steps == T:
            gi_chunk = gi                       # whole padded array, no copy
        else:
            gi_chunk = gi[t0 * N_pad:(t0 + n_steps) * N_pad]
        gi_rows = gi_chunk.shape[0]

        seq_cost = pl.CostEstimate(
            flops=2 * chunk_rows * (H * 3 * H + H * O_pad),
            transcendentals=3 * chunk_rows * H,
            bytes_accessed=(gi_rows * 3 * H * gi_bytes
                            + chunk_rows * (H + O_pad) * 4
                            + (H * 3 * H + H * O_pad) * w_bytes
                            + (3 * H + O_pad) * 4 + 2 * N_pad * H * 4),
        )
        kern = functools.partial(_gru_chunk_kernel, n_steps=n_steps,
                                 step_rows=N_pad, unroll=min(4, n_steps))
        hh_c, q_c, h_carry = pl.pallas_call(
            kern,
            out_shape=(jax.ShapeDtypeStruct((chunk_rows, H), jnp.float32),
                       jax.ShapeDtypeStruct((chunk_rows, O_pad), jnp.float32),
                       jax.ShapeDtypeStruct((N_pad, H), jnp.float32)),
            grid_spec=pltpu.PrefetchScalarGridSpec(
                num_scalar_prefetch=0,
                grid=(1,),
                in_specs=[
                    pl.BlockSpec((gi_rows, 3 * H), full2),   # gi resident
                    pl.BlockSpec((N_pad, H), full2),         # h0 / chunk carry
                    pl.BlockSpec((H, 3 * H), full2),         # W_hh resident
                    pl.BlockSpec((1, 3 * H), full2),
                    pl.BlockSpec((H, O_pad), full2),         # W2 (lane-padded)
                    pl.BlockSpec((1, O_pad), full2),
                ],
                out_specs=(pl.BlockSpec((chunk_rows, H), full2),
                           pl.BlockSpec((chunk_rows, O_pad), full2),
                           pl.BlockSpec((N_pad, H), full2)),
                scratch_shapes=[pltpu.VMEM((N_pad, H), jnp.float32)],
            ),
            compiler_params=pltpu.CompilerParams(
                dimension_semantics=("arbitrary",),
                vmem_limit_bytes=32 * 1024 * 1024),
            cost_estimate=seq_cost,
        )(gi_chunk, h_carry, params["w_hh"], params["b_hh"],
          params["w2_pad"], params["b2_pad"])
        hh_chunks.append(hh_c)
        q_chunks.append(q_c)
        t0 += n_steps

    hh2d = hh_chunks[0] if len(hh_chunks) == 1 else jnp.concatenate(hh_chunks, 0)
    q2d = q_chunks[0] if len(q_chunks) == 1 else jnp.concatenate(q_chunks, 0)

    q_seq = q2d.reshape(T, N_pad, O_pad)[:, :N, :O].reshape(T, b, a, O)
    hh_seq = hh2d.reshape(T, N_pad, H)[:, :N, :].reshape(T, b, a, H)
    return q_seq, hh_seq


def nrnn_agent_forward(inputs, hidden_state, params, *, matmul_dtype=jnp.float32):
    """Single step, matching NRNNAgent.forward(inputs (b,a,e), hidden (b,a,H))."""
    q_seq, hh_seq = nrnn_agent_forward_seq(inputs[None], hidden_state, params,
                                           matmul_dtype=matmul_dtype)
    return q_seq[0], hh_seq[0]


# ---------------------------------------------------------------------------
# Params + pure-JAX reference
# ---------------------------------------------------------------------------
def init_params(key, input_shape, hidden_dim, out_dim):
    """Deterministic synthetic init (uniform, fan-in scaled, PyTorch-like)."""
    ks = jax.random.split(key, 10)

    def u(k, shape, fan_in):
        bound = 1.0 / np.sqrt(fan_in)
        return jax.random.uniform(k, shape, jnp.float32, -bound, bound)

    H = hidden_dim
    return {
        "w1":   u(ks[0], (input_shape, H), input_shape),
        "b1":   u(ks[1], (1, H), input_shape),
        "w_ih": u(ks[2], (H, 3 * H), H),
        "w_hh": u(ks[3], (H, 3 * H), H),
        "b_ih": u(ks[4], (1, 3 * H), H),
        "b_hh": u(ks[5], (1, 3 * H), H),
        "w2":   u(ks[6], (H, out_dim), H),
        "b2":   u(ks[7], (1, out_dim), H),
    }


def _reference_step(x3d, h3d, params):
    b, a, e = x3d.shape
    H = params["w1"].shape[1]
    x = x3d.reshape(-1, e)
    h = h3d.reshape(-1, H)
    xr = jnp.maximum(x @ params["w1"] + params["b1"], 0.0)
    gi = xr @ params["w_ih"] + params["b_ih"]
    gh = h @ params["w_hh"] + params["b_hh"]
    i_r, i_z, i_n = jnp.split(gi, 3, axis=1)
    h_r, h_z, h_n = jnp.split(gh, 3, axis=1)
    r = jax.nn.sigmoid(i_r + h_r)
    z = jax.nn.sigmoid(i_z + h_z)
    n = jnp.tanh(i_n + r * h_n)
    hh = (1.0 - z) * n + z * h
    q = hh @ params["w2"] + params["b2"]
    return q.reshape(b, a, -1), hh.reshape(b, a, -1)


def _reference_seq(x_seq, h0, params):
    qs, hs = [], []
    h = h0
    for t in range(x_seq.shape[0]):
        q, h = _reference_step(x_seq[t], h, params)
        qs.append(q)
        hs.append(h)
    return jnp.stack(qs), jnp.stack(hs)


if __name__ == "__main__":
    # Module config: use_n_lambda=True, n_lambda=2, n_actions=8 -> fc2 out = 16
    B, A = 2, 4                 # batch, n_agents -> N = 8 rows per step
    T = 8                       # rollout length for the in-kernel time loop
    INPUT_SHAPE = 32
    HIDDEN_DIM = 128
    N_LAMBDA = 2
    N_ACTIONS = 8
    OUT_DIM = N_LAMBDA * N_ACTIONS

    key = jax.random.PRNGKey(0)
    k_in, k_h, k_p = jax.random.split(key, 3)

    inputs_seq = jax.random.normal(k_in, (T, B, A, INPUT_SHAPE), jnp.float32)
    hidden = jax.random.normal(k_h, (B, A, HIDDEN_DIM), jnp.float32)
    params = init_params(k_p, INPUT_SHAPE, HIDDEN_DIM, OUT_DIM)

    # Weight prep hoisted out of the per-call path (done once per param set).
    prepared_f32 = prepare_params(params, jnp.float32)
    prepared_bf16 = prepare_params(params, jnp.bfloat16)

    # --- single step (exact NRNNAgent.forward semantics), f32 ---------------
    q1, hh1 = nrnn_agent_forward(inputs_seq[0], hidden, prepared_f32)
    q1 = jax.block_until_ready(q1)
    hh1 = jax.block_until_ready(hh1)
    q1_ref, hh1_ref = _reference_step(inputs_seq[0], hidden, params)
    np.testing.assert_allclose(np.asarray(q1), np.asarray(q1_ref), rtol=1e-5, atol=1e-5)
    np.testing.assert_allclose(np.asarray(hh1), np.asarray(hh1_ref), rtol=1e-5, atol=1e-5)
    assert q1.shape == (B, A, OUT_DIM) and hh1.shape == (B, A, HIDDEN_DIM)

    # --- T-step rollout, time loop inside ONE kernel invocation, f32 --------
    fwd = jax.jit(nrnn_agent_forward_seq)
    q_seq, hh_seq = jax.block_until_ready(fwd(inputs_seq, hidden, prepared_f32))
    q_ref, hh_ref = _reference_seq(inputs_seq, hidden, params)
    np.testing.assert_allclose(np.asarray(q_seq), np.asarray(q_ref), rtol=1e-5, atol=1e-5)
    np.testing.assert_allclose(np.asarray(hh_seq), np.asarray(hh_ref), rtol=1e-5, atol=1e-5)
    assert q_seq.shape == (T, B, A, OUT_DIM) and hh_seq.shape == (T, B, A, HIDDEN_DIM)

    # --- bf16 MXU operands + bf16 gi round trip; gate math stays f32 --------
    q_bf, hh_bf = jax.block_until_ready(fwd(inputs_seq, hidden, prepared_bf16))
    np.testing.assert_allclose(np.asarray(q_bf), np.asarray(q_ref), rtol=0.0, atol=0.1)
    np.testing.assert_allclose(np.asarray(hh_bf), np.asarray(hh_ref), rtol=0.0, atol=0.1)

    print("KERNEL_OK")
</pallas_src>

<mosaic_0001>
module attributes {stable_mosaic.version = 11 : i64} {
  func.func @_precompute_kernel(%arg0: i32, %arg1: memref<8x32xf32, #tpu.memory_space<vmem>>, %arg2: memref<32x128xf32, #tpu.memory_space<vmem>>, %arg3: memref<1x128xf32, #tpu.memory_space<vmem>>, %arg4: memref<128x384xf32, #tpu.memory_space<vmem>>, %arg5: memref<1x384xf32, #tpu.memory_space<vmem>>, %arg6: memref<8x384xf32, #tpu.memory_space<vmem>>) attributes {dimension_semantics = [#tpu.dimension_semantics<parallel>], iteration_bounds = array<i64: 1>, scalar_prefetch = 0 : i64, scratch_operands = 0 : i64, tpu.core_type = #tpu.core_type<tc>, window_params = [{transform_indices = @transform_0, window_bounds = array<i64: 8, 32>}, {pipeline_mode = #tpu.pipeline_mode<synchronous>, transform_indices = @transform_1, window_bounds = array<i64: 32, 128>}, {pipeline_mode = #tpu.pipeline_mode<synchronous>, transform_indices = @transform_2, window_bounds = array<i64: 1, 128>}, {pipeline_mode = #tpu.pipeline_mode<synchronous>, transform_indices = @transform_3, window_bounds = array<i64: 128, 384>}, {pipeline_mode = #tpu.pipeline_mode<synchronous>, transform_indices = @transform_4, window_bounds = array<i64: 1, 384>}, {transform_indices = @transform_5, window_bounds = array<i64: 8, 384>}]} {
    %c0 = arith.constant 0 : index
    %c0_0 = arith.constant 0 : index
    %0 = vector.load %arg1[%c0, %c0_0] : memref<8x32xf32, #tpu.memory_space<vmem>>, vector<8x32xf32>
    %c0_1 = arith.constant 0 : index
    %c0_2 = arith.constant 0 : index
    %1 = vector.load %arg2[%c0_1, %c0_2] : memref<32x128xf32, #tpu.memory_space<vmem>>, vector<32x128xf32>
    %cst = arith.constant dense<0.000000e+00> : vector<8x128xf32>
    %2 = tpu.matmul %0, %1, %cst {dimension_numbers = #tpu.dot_dimension_numbers<[1], [0], [0], [1], [0, 0, 1, 1], [], []>} : vector<8x32xf32>, vector<32x128xf32>, vector<8x128xf32> -> vector<8x128xf32>
    %c0_3 = arith.constant 0 : index
    %c0_4 = arith.constant 0 : index
    %3 = vector.load %arg3[%c0_3, %c0_4] : memref<1x128xf32, #tpu.memory_space<vmem>>, vector<1x128xf32>
    %4 = vector.broadcast %3 : vector<1x128xf32> to vector<8x128xf32>
    %5 = arith.addf %2, %4 : vector<8x128xf32>
    %cst_5 = arith.constant 0.000000e+00 : f32
    %6 = vector.broadcast %cst_5 : f32 to vector<8x128xf32>
    %7 = arith.maximumf %5, %6 : vector<8x128xf32>
    %c0_6 = arith.constant 0 : index
    %c0_7 = arith.constant 0 : index
    %8 = vector.load %arg4[%c0_6, %c0_7] : memref<128x384xf32, #tpu.memory_space<vmem>>, vector<128x384xf32>
    %cst_8 = arith.constant dense<0.000000e+00> : vector<8x384xf32>
    %9 = tpu.matmul %7, %8, %cst_8 {dimension_numbers = #tpu.dot_dimension_numbers<[1], [0], [0], [1], [0, 0, 1, 1], [], []>} : vector<8x128xf32>, vector<128x384xf32>, vector<8x384xf32> -> vector<8x384xf32>
    %c0_9 = arith.constant 0 : index
    %c0_10 = arith.constant 0 : index
    %10 = vector.load %arg5[%c0_9, %c0_10] : memref<1x384xf32, #tpu.memory_space<vmem>>, vector<1x384xf32>
    %11 = vector.broadcast %10 : vector<1x384xf32> to vector<8x384xf32>
    %12 = arith.addf %9, %11 : vector<8x384xf32>
    %c0_11 = arith.constant 0 : index
    %c0_12 = arith.constant 0 : index
    %13 = vector.load %arg6[%c0_11, %c0_12] : memref<8x384xf32, #tpu.memory_space<vmem>>, vector<8x384xf32>
    tpu.vector_store %arg6[%c0_11, %c0_12], %12 {strides = array<i32>} : memref<8x384xf32, #tpu.memory_space<vmem>>, vector<8x384xf32>,
    return
  }
  func.func @transform_0(%arg0: i32) -> (i32, i32) {
    %c0_i32 = arith.constant 0 : i32
    %c0_i32_0 = arith.constant 0 : i32
    return %arg0, %c0_i32 : i32, i32
  }
  func.func @transform_1(%arg0: i32) -> (i32, i32) {
    %c0_i32 = arith.constant 0 : i32
    %c0_i32_0 = arith.constant 0 : i32
    %c0_i32_1 = arith.constant 0 : i32
    return %c0_i32, %c0_i32_0 : i32, i32
  }
  func.func @transform_2(%arg0: i32) -> (i32, i32) {
    %c0_i32 = arith.constant 0 : i32
    %c0_i32_0 = arith.constant 0 : i32
    %c0_i32_1 = arith.constant 0 : i32
    return %c0_i32, %c0_i32_0 : i32, i32
  }
  func.func @transform_3(%arg0: i32) -> (i32, i32) {
    %c0_i32 = arith.constant 0 : i32
    %c0_i32_0 = arith.constant 0 : i32
    %c0_i32_1 = arith.constant 0 : i32
    return %c0_i32, %c0_i32_0 : i32, i32
  }
  func.func @transform_4(%arg0: i32) -> (i32, i32) {
    %c0_i32 = arith.constant 0 : i32
    %c0_i32_0 = arith.constant 0 : i32
    %c0_i32_1 = arith.constant 0 : i32
    return %c0_i32, %c0_i32_0 : i32, i32
  }
  func.func @transform_5(%arg0: i32) -> (i32, i32) {
    %c0_i32 = arith.constant 0 : i32
    %c0_i32_0 = arith.constant 0 : i32
    return %arg0, %c0_i32 : i32, i32
  }
}

</mosaic_0001>

<bundles_post_ra>
// kernel: tpu_custom_call.1
= control target key start
LH: loop header
LB: loop body
LE: loop exit
PB: predicated region body
PF: predicated region fallthrough
CT: control target
= control target key end

     0   :  { %10 = vsyncpa [#allocation3], 0  ;;  %s716_s0 = inlined_call_operand.hbm [shape: f32[8,32], index: 0, kind: input, shape index: {}]   ;;  %s717_s1 = inlined_call_operand.hbm [shape: f32[32,128], index: 1, kind: input, shape index: {}]   ;;  %s718_s2 = inlined_call_operand.vmem [shape: f32[1,128], index: 2, kind: input, shape index: {}]   ;;  %s719_s3 = inlined_call_operand.hbm [shape: f32[128,384], index: 3, kind: input, shape index: {}]   ;;  %s720_s4 = inlined_call_operand.vmem [shape: f32[1,384], index: 4, kind: input, shape index: {}]   ;;  %s721_s5 = inlined_call_operand.hbm [shape: f32[8,384], index: 5, kind: output, shape index: {}]  }
   0x1   :  { %11 = vsyncpa [#allocation6], 0 }
   0x2   :  { %12 = vsyncpa [#allocation4], 0  ;;  %s609_s18 = smov [#allocation5]   ;;  %s515_s22 = scalar_lea.hbm %s717_s1, 512 }
   0x3   :  { %s28_s19 = sshll.u32 %s609_s18, 4  ;;  %p516_p0 = scmp.ne.s32.totalorder %s717_s1, %s515_s22  ;;  %s29_s19 = int_to_ptr.vmem [resolvable:$true] %s28_s19 }
   0x4   :  { %p519_p1 = scmp.lt.u32.totalorder %s515_s22, %s717_s1 }
   0x6   :  { %p521_p2 = pnand %p519_p1, %p516_p0 }
   0x8   :  { %524 = shalt.err (!%p521_p2)
}
   0x9   :  { %s525_s27 = scalar_lea.vmem %s29_s19, 512  ;;  %p530_p4 = scmp.lt.s32.totalorder %s29_s19, %s29_s19 }
   0xa   :  { %p526_p3 = scmp.ne.s32.totalorder %s29_s19, %s525_s27  ;;  %p531_p5 = scmp.lt.s32.totalorder %s525_s27, %s525_s27 }
   0xc   :  { %p532_p6 = por %p531_p5, %p530_p4 }
   0xe   :  { %p533_p7 = pnand %p532_p6, %p526_p3 }
  0x10   :  { %536 = shalt.err (!%p533_p7)
}
  0x11   :  { %s610_s28 = smov 128   ;;  %s611_s29 = smov 8  }
  0x12   :  { %34 = dma.hbm_to_vmem [thread:$0]  %s717_s1, 512, %s29_s19, [#allocation6], %s610_s28, %s610_s28, %s611_s29  }
  0x13   :  { %s612_s7 = smov [#allocation2]   ;;  %s613_s9 = smov [#allocation7]  }
  0x14   :  { %s19_s8 = sshll.u32 %s612_s7, 4  ;;  %s42_s10 = sshll.u32 %s613_s9, 4  ;;  %s20_s8 = int_to_ptr.vmem [resolvable:$true] %s19_s8  ;;  %s43_s10 = int_to_ptr.vmem [resolvable:$true] %s42_s10 }
  0x15   :  { %s537_s13 = scalar_lea.hbm %s716_s0, 128 }
  0x16   :  { %p538_p8 = scmp.ne.s32.totalorder %s716_s0, %s537_s13  ;;  %p541_p9 = scmp.lt.u32.totalorder %s537_s13, %s716_s0 }
  0x18   :  { %p543_p10 = pnand %p541_p9, %p538_p8 }
  0x1a   :  { %546 = shalt.err (!%p543_p10)
}
  0x1b   :  { %s547_s1 = scalar_lea.vmem %s20_s8, 128  ;;  %p552_p12 = scmp.lt.s32.totalorder %s20_s8, %s20_s8 }
  0x1c   :  { %p548_p11 = scmp.ne.s32.totalorder %s20_s8, %s547_s1  ;;  %p553_p13 = scmp.lt.s32.totalorder %s547_s1, %s547_s1 }
  0x1e   :  { %p554_p0 = por %p553_p13, %p552_p12 }
  0x20   :  { %p555_p1 = pnand %p554_p0, %p548_p11 }
  0x22   :  { %558 = shalt.err (!%p555_p1)
}
  0x23   :  { %22 = dma.hbm_to_vmem [thread:$0]  %s716_s0, 128, %s20_s8, [#allocation3]  }
  0x24   :  { %s559_s22 = scalar_lea.hbm %s719_s3, 6144 }
  0x25   :  { %p560_p2 = scmp.ne.s32.totalorder %s719_s3, %s559_s22  ;;  %p563_p3 = scmp.lt.u32.totalorder %s559_s22, %s719_s3 }
  0x27   :  { %p565_p4 = pnand %p563_p3, %p560_p2 }
  0x29   :  { %568 = shalt.err (!%p565_p4)
}
  0x2a   :  { %s569_s27 = scalar_lea.vmem %s43_s10, 6144  ;;  %p574_p6 = scmp.lt.s32.totalorder %s43_s10, %s43_s10 }
  0x2b   :  { %p570_p5 = scmp.ne.s32.totalorder %s43_s10, %s569_s27  ;;  %p575_p7 = scmp.lt.s32.totalorder %s569_s27, %s569_s27 }
  0x2d   :  { %p576_p8 = por %p575_p7, %p574_p6 }
  0x2f   :  { %p577_p9 = pnand %p576_p8, %p570_p5 }
  0x31   :  { %580 = shalt.err (!%p577_p9)
}
  0x32   :  { %s614_s0 = smov 384   ;;  %s615_s28 = smov 24  }
  0x33   :  { %48 = dma.hbm_to_vmem [thread:$0]  %s719_s3, 6144, %s43_s10, [#allocation6], %s614_s0, %s614_s0, %s615_s28  }
  0x34   :  { %603 = dma.done.wait [#allocation3], 128  }
  0x35   :  { %604 = vsyncadd [#allocation3], 4294967168 }
  0x36   :  { %605 = dma.done.wait [#allocation6], 6656  }
  0x37   :  { %606 = vsyncadd [#allocation6], 4294960640  ;;  %v616_v0 = vmov 0.0|0.0   ;;  %vm617_vm0 = vmmov 0   ;;  %v618_v1 = vmov 0.0   ;;  %v61_v2 = vld [vmem:[#allocation5] sm:$0xff] }
  0x38   :  { %442 = vmatprep.subr.bf16.mxu0 %v616_v0  ;;  %404 = vmatprep.mubr.msk.f32.mxu0 %vm617_vm0, %v618_v1  ;;  %v62_v3 = vld [vmem:[#allocation5 + $0x8] sm:$0xff]  ;;  %v63_v4 = vld [vmem:[#allocation5 + $0x10] sm:$0xff]  ;;  %v64_v6 = vld [vmem:[#allocation5 + $0x18] sm:$0xff]  ;;  %vm72_vm1 = vcmask 261120   ;;  %s619_s9 = smov [#allocation8]  }
  0x39   :  { %276 = vmatprep.mubr.f32.mxu1 %v618_v1  ;;  %v443_v5 = vpack.c.bf16 %v62_v3, %v61_v2  ;;  %v148_v7 = vld [vmem:[#allocation7 + $0x8] sm:$0xff]  ;;  %v151_v8 = vld [vmem:[#allocation7 + $0x20] sm:$0xff]  ;;  %v150_v10 = vld [vmem:[#allocation7 + $0x18] sm:$0xff]  ;;  %v446_v11 = vpack.c.bf16 %v64_v6, %v63_v4 }
  0x3a   :  { %v147_v9 = vld [vmem:[#allocation7] sm:$0xff]  ;;  %v448_v12 = vpack.c.bf16 %v151_v8, %v148_v7  ;;  %v149_v14 = vld [vmem:[#allocation7 + $0x10] sm:$0xff]  ;;  %v152_v15 = vld [vmem:[#allocation7 + $0x28] sm:$0xff] }
  0x3b   :  { %444 = vmatpush3.bf16.msra.mxu0 %v443_v5  ;;  %v450_v13 = vpack.c.bf16 %v150_v10, %v147_v9  ;;  %v154_v16 = vld [vmem:[#allocation7 + $0x38] sm:$0xff]  ;;  %v157_v17 = vld [vmem:[#allocation7 + $0x50] sm:$0xff]  ;;  %v156_v19 = vld [vmem:[#allocation7 + $0x48] sm:$0xff]  ;;  %v481_v25 = vpack.c.bf16 %v152_v15, %v149_v14 }
  0x3c   :  { %445 = vmatprep.subr.bf16.mxu0 %v616_v0  ;;  %v153_v18 = vld [vmem:[#allocation7 + $0x30] sm:$0xff]  ;;  %449 = vmatprep.subr.bf16.mxu1 %v448_v12  ;;  %v452_v20 = vpack.c.bf16 %v157_v17, %v154_v16  ;;  %v160_v21 = vld [vmem:[#allocation7 + $0x68] sm:$0xff]  ;;  %v60_v22 = vld [vmem:[#allocation2] sm:$0xff] }
  0x3d   :  { %451 = vmatpush1.bf16.msra.mxu1 %v450_v13  ;;  %v454_v23 = vpack.c.bf16 %v156_v19, %v153_v18  ;;  %v163_v24 = vld [vmem:[#allocation7 + $0x80] sm:$0xff]  ;;  %v162_v29 = vld [vmem:[#allocation7 + $0x78] sm:$0xff]  ;;  %v169_v32 = vld [vmem:[#allocation7 + $0xb0] sm:$0xff] }
  0x3e   :  { %453 = vmatprep.subr.bf16.mxu1 %v452_v20  ;;  %v155_v26 = vld [vmem:[#allocation7 + $0x40] sm:$0xff]  ;;  %v456_v27 = vpack.c.bf16 %v163_v24, %v160_v21  ;;  %v158_v30 = vld [vmem:[#allocation7 + $0x58] sm:$0xff]  ;;  %v161_v35 = vld [vmem:[#allocation7 + $0x70] sm:$0xff] }
  0x3f   :  { %447 = vmatpush3.bf16.msra.mxu0 %v446_v11  ;;  %v159_v28 = vld [vmem:[#allocation7 + $0x60] sm:$0xff]  ;;  %v166_v31 = vld [vmem:[#allocation7 + $0x98] sm:$0xff]  ;;  %v484_v34 = vpack.c.bf16 %v158_v30, %v155_v26  ;;  %v165_v37 = vld [vmem:[#allocation7 + $0x90] sm:$0xff] }
  0x40   :  { %480 = vmatprep.subr.bf16.mxu0 %v616_v0  ;;  %v458_v33 = vpack.c.bf16 %v162_v29, %v159_v28  ;;  %v460_v36 = vpack.c.bf16 %v169_v32, %v166_v31  ;;  %v168_v38 = vld [vmem:[#allocation7 + $0xa8] sm:$0xff]  ;;  %v175_v41 = vld [vmem:[#allocation7 + $0xe0] sm:$0xff]  ;;  %v174_v47 = vld [vmem:[#allocation7 + $0xd8] sm:$0xff] }
  0x41   :  { %455 = vmatpush1.bf16.msra.mxu1 %v454_v23  ;;  %v164_v39 = vld [vmem:[#allocation7 + $0x88] sm:$0xff]  ;;  %v462_v42 = vpack.c.bf16 %v168_v38, %v165_v37  ;;  %v167_v44 = vld [vmem:[#allocation7 + $0xa0] sm:$0xff]  ;;  %v170_v48 = vld [vmem:[#allocation7 + $0xb8] sm:$0xff] }
  0x42   :  { %405 = vmatmul.mubr.msk.f32.vlgmr.msra.gmra.mrb[0].mxu0 %vm72_vm1, %v60_v22  ;;  %457 = vmatprep.subr.bf16.mxu1 %v456_v27  ;;  %v172_v40 = vld [vmem:[#allocation7 + $0xc8] sm:$0xff]  ;;  %v487_v43 = vpack.c.bf16 %v164_v39, %v161_v35  ;;  %v171_v46 = vld [vmem:[#allocation7 + $0xc0] sm:$0xff]  ;;  %v178_v49 = vld [vmem:[#allocation7 + $0xf8] sm:$0xff]  ;;  %v490_v52 = vpack.c.bf16 %v170_v48, %v167_v44  ;;  %v197_v22 = vlaneseq }
  0x43   :  { %482 = vmatpush3.bf16.msra.mxu0 %v481_v25  ;;  %439 = vmatprep.mubr.msk.f32.mxu0 %vm617_vm0, %v618_v1  ;;  %v464_v45 = vpack.c.bf16 %v175_v41, %v172_v40  ;;  %v181_v50 = vld [vmem:[#allocation7 + $0x110] sm:$0xff]  ;;  %v466_v51 = vpack.c.bf16 %v174_v47, %v171_v46  ;;  %v180_v56 = vld [vmem:[#allocation7 + $0x108] sm:$0xff]  ;;  %v187_v59 = vld [vmem:[#allocation7 + $0x140] sm:$0xff] }
  0x44   :  { %483 = vmatprep.subr.bf16.mxu0 %v616_v0  ;;  %v173_v53 = vld [vmem:[#allocation7 + $0xd0] sm:$0xff]  ;;  %v468_v54 = vpack.c.bf16 %v181_v50, %v178_v49  ;;  %v176_v57 = vld [vmem:[#allocation7 + $0xe8] sm:$0xff]  ;;  %v183_v63 = vld [vmem:[#allocation7 + $0x120] sm:$0xff]  ;;  %v198_v23 = vshrl.u32 %v197_v22, 7 }
  0x45   :  { %459 = vmatpush1.bf16.msra.mxu1 %v458_v33  ;;  %v177_v55 = vld [vmem:[#allocation7 + $0xf0] sm:$0xff]  ;;  %v184_v58 = vld [vmem:[#allocation7 + $0x128] sm:$0xff]  ;;  %v493_v61 = vpack.c.bf16 %v176_v57, %v173_v53  ;;  %v186_v1 = vld [vmem:[#allocation7 + $0x138] sm:$0xff] }
  0x46   :  { %461 = vmatprep.subr.bf16.mxu1 %v460_v36  ;;  %v470_v60 = vpack.c.bf16 %v180_v56, %v177_v55  ;;  %v472_v62 = vpack.c.bf16 %v187_v59, %v184_v58  ;;  %v179_v2 = vld [vmem:[#allocation7 + $0x100] sm:$0xff]  ;;  %v182_v3 = vld [vmem:[#allocation7 + $0x118] sm:$0xff]  ;;  %v474_v4 = vpack.c.bf16 %v186_v1, %v183_v63  ;;  %v185_v6 = vld [vmem:[#allocation7 + $0x130] sm:$0xff]  ;;  %v199_v24 = vsub.s32 0, %v198_v23 }
  0x47   :  { %485 = vmatpush3.bf16.msra.mxu0 %v484_v34  ;;  %v496_v5 = vpack.c.bf16 %v182_v3, %v179_v2  ;;  %v188_v7 = vld [vmem:[#allocation7 + $0x148] sm:$0xff]  ;;  %v190_v9 = vld [vmem:[#allocation7 + $0x158] sm:$0xff]  ;;  %v193_v10 = vld [vmem:[#allocation7 + $0x170] sm:$0xff]  ;;  %v207_v25 = vsub.s32 2, %v198_v23  ;;  %v203_v27 = vsub.s32 1, %v198_v23 }
  0x48   :  { %486 = vmatprep.subr.bf16.mxu0 %v616_v0  ;;  %v499_v8 = vpack.c.bf16 %v188_v7, %v185_v6  ;;  %v476_v11 = vpack.c.bf16 %v193_v10, %v190_v9  ;;  %v189_v12 = vld [vmem:[#allocation7 + $0x150] sm:$0xff]  ;;  %v192_v13 = vld [vmem:[#allocation7 + $0x168] sm:$0xff]  ;;  %v191_v14 = vld [vmem:[#allocation7 + $0x160] sm:$0xff] }
  0x49   :  { %463 = vmatpush1.bf16.msra.mxu1 %v462_v42  ;;  %v478_v15 = vpack.c.bf16 %v192_v13, %v189_v12  ;;  %v194_v16 = vld [vmem:[#allocation7 + $0x178] sm:$0xff] }
  0x4a   :  { %465 = vmatprep.subr.bf16.mxu1 %v464_v45  ;;  %v502_v17 = vpack.c.bf16 %v194_v16, %v191_v14  ;;  %v372_v18 = vld [vmem:[%s718_s2] ss:$0 sm:$0xff]  ;;  %s362_s2 = sshll.u32 %s619_s9, 4  ;;  %s363_s2 = int_to_ptr.vmem [resolvable:$true] %s362_s2 }
  0x4b   :  { %488 = vmatpush3.bf16.msra.mxu0 %v487_v43  ;;  %v195_v26 = vld [vmem:[%s720_s4] sm:$0x7]  ;;  %s581_s10 = scalar_lea.vmem %s363_s2, 384  ;;  %p586_p11 = scmp.lt.s32.totalorder %s363_s2, %s363_s2 }
  0x4c   :  { %489 = vmatprep.subr.bf16.mxu0 %v616_v0  ;;  %v200_v28 = vrot.slane %v195_v26, %v199_v24  ;;  %v208_v29 = vrot.slane %v195_v26, %v207_v25  ;;  %v204_v30 = vrot.slane %v195_v26, %v203_v27  ;;  %p582_p10 = scmp.ne.s32.totalorder %s363_s2, %s581_s10  ;;  %p587_p12 = scmp.lt.s32.totalorder %s581_s10, %s581_s10 }
  0x4d   :  { %467 = vmatpush1.bf16.msra.mxu1 %v466_v51 }
  0x4e   :  { %469 = vmatprep.subr.bf16.mxu1 %v468_v54  ;;  %p588_p13 = por %p587_p12, %p586_p11 }
  0x4f   :  { %491 = vmatpush3.bf16.msra.mxu0 %v490_v52 }
  0x50   :  { %492 = vmatprep.subr.bf16.mxu0 %v616_v0  ;;  %p589_p0 = pnand %p588_p13, %p582_p10 }
  0x51   :  { %471 = vmatpush1.bf16.msra.mxu1 %v470_v60 }
  0x52   :  { %473 = vmatprep.subr.bf16.mxu1 %v472_v62 }
  0x53   :  { %494 = vmatpush3.bf16.msra.mxu0 %v493_v61 }
  0x54   :  { %495 = vmatprep.subr.bf16.mxu0 %v616_v0 }
  0x55   :  { %475 = vmatpush1.bf16.msra.mxu1 %v474_v4 }
  0x56   :  { %477 = vmatprep.subr.bf16.mxu1 %v476_v11 }
  0x57   :  { %497 = vmatpush3.bf16.msra.mxu0 %v496_v5 }
  0x58   :  { %498 = vmatprep.subr.bf16.mxu0 %v616_v0 }
  0x59   :  { %479 = vmatpush1.bf16.msra.mxu1 %v478_v15 }
  0x5b   :  { %500 = vmatpush3.bf16.msra.mxu0 %v499_v8 }
  0x5c   :  { %501 = vmatprep.subr.bf16.mxu0 %v616_v0 }
  0x5f   :  { %503 = vmatpush3.bf16.msra.mxu0 %v502_v17 }
 0x115   :  { %v142_v19 = vpop.f32.mrb[0].mxu0 }
 0x116   :  { %v143_v20 = vadd.f32 %v372_v18, %v142_v19  ;;  %v406_v21 = vpop.f32.mrb[1].mxu0 }
 0x118   :  { %v146_v0 = vmax.f32 %v143_v20, 0.0 }
 0x11a   :  { %277 = vmatmul.mubr.f32.vlgmr.msra.gmra.mrb[0].mxu1 %v146_v0  ;;  %440 = vmatmul.mubr.f32.vlgmr.msra.gmra.mrb[2].mxu0 %v146_v0 }
 0x1ed   :  { %v278_v31 = vpop.f32.mrb[0].mxu1  ;;  %v349_v32 = vpop.f32.mrb[2].mxu0 }
 0x1ee   :  { %v279_v33 = vadd.f32 %v278_v31, %v200_v28  ;;  %v350_v34 = vadd.f32 %v349_v32, %v208_v29  ;;  %v280_v35 = vpop.f32.mrb[1].mxu1  ;;  %v441_v36 = vpop.f32.mrb[3].mxu0 }
 0x1ef   :  { %v281_v37 = vadd.f32 %v280_v35, %v204_v30 }
 0x1f0   :  { %353 = vst [vmem:[#allocation8] sm:$0xff] %v279_v33  ;;  %355 = vst [vmem:[#allocation8 + $0x10] sm:$0xff] %v350_v34 }
 0x1f1   :  { %354 = vst [vmem:[#allocation8 + $0x8] sm:$0xff] %v281_v37 }
 0x1f2   :  { %592 = shalt.err (!%p589_p0)
}
 0x1f3   :  { %s593_s12 = scalar_lea.hbm %s721_s5, 384 }
 0x1f4   :  { %p594_p1 = scmp.ne.s32.totalorder %s721_s5, %s593_s12  ;;  %p597_p2 = scmp.lt.u32.totalorder %s593_s12, %s721_s5 }
 0x1f6   :  { %p599_p3 = pnand %p597_p2, %p594_p1 }
 0x1f8   :  { %602 = shalt.err (!%p599_p3)
}
 0x1f9   :  { %365 = dma.vmem_to_hbm [thread:$0]  %s363_s2, 384, %s721_s5, [#allocation4]  }
 0x1fa   :  { %607 = dma.done.wait [#allocation4], 384  }
 0x1fb   :  { %608 = vsyncadd [#allocation4], 4294966912 }
 0x1fc   :  { %369 = vsyncpa [#allocation3], 1 }
 0x1fd   :  { %370 = vsyncpa [#allocation6], 1 }
 0x1fe   :  { %371 = vsyncpa [#allocation4], 1 }

</bundles_post_ra>
